<compile_context>
chip_gen: v5e
topology: v5e:2x2
jax: 0.10.0
libtpu: 0.0.40
codegen_flags: <defaults>
</compile_context>

<pallas_src>
import jax
import jax.numpy as jnp
from jax.experimental import pallas as pl
from jax.experimental.pallas import tpu as pltpu


# --------------------------------- helpers ----------------------------------- #
def _round_up(x, m):
    return ((x + m - 1) // m) * m


def _pad_to(a, shape):
    pads = [(0, t - s) for s, t in zip(a.shape, shape)]
    return jnp.pad(a, pads) if any(p[1] for p in pads) else a


def _vmem_info():
    """Physical-VMEM-aware budgets: explicit vmem_limit_bytes + a tile-sizing budget."""
    phys = 64 << 20  # conservative fallback (v7x-sized)
    try:
        phys = int(pltpu.get_tpu_info().vmem_capacity_bytes)
    except Exception:
        pass
    vmem_limit = min(int(phys * 3 // 4), 100 << 20)   # ~96 MiB on v5e/v6e, ~48 MiB on v7x
    tile_budget = int(vmem_limit * 0.7)
    two_cores = phys <= (64 << 20)                    # v7x-like: 64 MiB per TC, 2 TCs/chip
    return vmem_limit, tile_budget, two_cores


def _pick_tiles(B, S, Fp, Hp, Op, C, Dcp, itemsize, tile_budget, two_cores, has_cells):
    """Choose (tb, ts) so the real (padded) per-step footprint fits the tile budget."""
    align = 8 if itemsize >= 4 else 16                # sublane pack (f32 / bf16 operands)

    ts_full = _round_up(max(S, 1), 16)
    if ts_full <= 256:
        ts, Sp = ts_full, ts_full
    else:
        ts, Sp = 256, _round_up(S, 256)

    def footprint(tb):
        f = 2 * tb * ts * Fp * itemsize                       # x tile (double-buffered)
        f += 2 * tb * ts * 128 * 4                            # mask block, lane-padded to 128
        f += 3 * tb * ts * Hp * 4                             # z / gelu / weighted f32 temps
        f += tb * Hp * 4                                      # enc accumulator scratch
        if has_cells:
            f += 2 * C * tb * Dcp * itemsize                  # cells tile (double-buffered)
            f += 4 * C * tb * Op * 4                          # out tile (x2) + f32 temp
            f += 2 * Dcp * Op * itemsize                      # cell-head weight (x2 buffers)
        else:
            f += 4 * tb * Op * 4
        f += 2 * (Fp * Hp + Hp * Op) * itemsize               # resident weights (x2 buffers)
        f += 2 * (8 * Hp + 8 * Op) * 4                        # biases (sublane-padded)
        return int(f * 1.2)                                   # compiler-temp headroom

    b_target = B
    if two_cores and B >= 16:
        b_target = (B + 1) // 2                               # >=2 batch tiles -> both TCs busy
    tb = _round_up(max(b_target, 1), align)
    while tb > align and footprint(tb) > tile_budget:
        tb = _round_up(tb // 2, align)
    tb = max(tb, align)
    while ts > 16 and footprint(tb) > tile_budget:            # last resort for huge S*F
        ts = max(16, ts // 2)
        Sp = _round_up(S, ts)

    Bp = _round_up(max(B, 1), tb)
    return tb, ts, Bp, Sp


# --------------------------------- kernels ----------------------------------- #
def _encode_accumulate(x_ref, mw_ref, we_ref, be_ref, enc_acc):
    """One sequence-tile step of the masked-mean-pooled GELU encoder (f32 accumulate)."""
    tb, ts, fp = x_ref.shape
    hp = we_ref.shape[1]

    @pl.when(pl.program_id(1) == 0)
    def _init():
        enc_acc[...] = jnp.zeros_like(enc_acc)

    xf = x_ref[...].reshape(tb * ts, fp)                       # free re-label (ts % 16 == 0)
    z = jnp.dot(xf, we_ref[...], preferred_element_type=jnp.float32)
    z = jax.nn.gelu(z + be_ref[...])                           # (tb*ts, Hp) f32 (VPU/EUP)
    zw = z.reshape(tb, ts, hp) * mw_ref[...]                   # mask/denominator weights
    enc_acc[...] += zw.sum(axis=1)                             # (tb, Hp) f32


def _fused_cells_kernel(x_ref, mw_ref, cells_ref, we_ref, be_ref,
                        whe_ref, whc_ref, bh_ref, out_ref, enc_acc):
    # x (tb,ts,Fp)  mw (tb,ts,1)  cells (C,tb,Dcp)  out (C,tb,Op)  enc_acc (tb,Hp) f32
    _encode_accumulate(x_ref, mw_ref, we_ref, be_ref, enc_acc)

    @pl.when(pl.program_id(1) == pl.num_programs(1) - 1)
    def _head():
        c, tb, dcp = cells_ref.shape
        op = out_ref.shape[-1]
        enc = enc_acc[...].astype(whe_ref.dtype)
        eo = jnp.dot(enc, whe_ref[...],
                     preferred_element_type=jnp.float32) + bh_ref[...]      # (tb, Op)
        cf = cells_ref[...].reshape(c * tb, dcp)               # free re-label (tb aligned)
        co = jnp.dot(cf, whc_ref[...], preferred_element_type=jnp.float32)  # (C*tb, Op)
        out_ref[...] = (co.reshape(c, tb, op) + eo[None, :, :]).astype(out_ref.dtype)


def _fused_nocells_kernel(x_ref, mw_ref, we_ref, be_ref, wh_ref, bh_ref,
                          out_ref, enc_acc):
    # out (tb, Op)
    _encode_accumulate(x_ref, mw_ref, we_ref, be_ref, enc_acc)

    @pl.when(pl.program_id(1) == pl.num_programs(1) - 1)
    def _head():
        enc = enc_acc[...].astype(wh_ref.dtype)
        out_ref[...] = (jnp.dot(enc, wh_ref[...], preferred_element_type=jnp.float32)
                        + bh_ref[...]).astype(out_ref.dtype)


# --------------------------------- wrapper ------------------------------------ #
def headed_encoder_wrapper_forward(params, x, mask=None, cellstosort=None,
                                   *, matmul_dtype=jnp.float32):
    """Fused forward pass of HeadedEncoderWrapper.

    matmul_dtype=jnp.bfloat16 halves MXU-operand HBM/VMEM traffic and is supported on
    v5e/v6e/v7x (the MXU is bf16 on all of them); elementwise math and accumulation
    stay f32 either way.
    """
    B, S, F = x.shape
    H = params["w_enc"].shape[1]
    O = params["w_head"].shape[1]
    ib = jnp.dtype(matmul_dtype).itemsize

    Fp, Hp, Op = _round_up(F, 128), _round_up(H, 128), _round_up(O, 128)

    if mask is None:
        mask = jnp.ones((B, S), jnp.float32)
    m = mask.astype(jnp.float32)
    # Fold the masked-mean denominator into the mask weights (no in-kernel divide).
    inv_den = 1.0 / jnp.maximum(m.sum(axis=1, keepdims=True), 1.0)
    mw = m * inv_den                                            # (B, S) f32

    vmem_limit, tile_budget, two_cores = _vmem_info()

    has_cells = cellstosort is not None
    if has_cells:
        C, Dc = cellstosort.shape[1], cellstosort.shape[2]
        Dcp = _round_up(Dc, 128)
    else:
        C, Dc, Dcp = 1, 0, 0

    tb, ts, Bp, Sp = _pick_tiles(B, S, Fp, Hp, Op, C, Dcp, ib,
                                 tile_budget, two_cores, has_cells)
    grid = (Bp // tb, Sp // ts)

    # Zero-pad batch / sequence / feature dims (exact: gelu(0)=0, zero weight rows/cols,
    # zero mask weights on padded positions); padded rows/cols are sliced off afterwards.
    xc = _pad_to(x.astype(matmul_dtype), (Bp, Sp, Fp))
    mw3 = _pad_to(mw, (Bp, Sp))[..., None]                      # (Bp, Sp, 1) f32
    w_enc = _pad_to(params["w_enc"].astype(matmul_dtype), (Fp, Hp))
    b_enc = _pad_to(params["b_enc"].reshape(1, H).astype(jnp.float32), (1, Hp))
    b_head = _pad_to(params["b_head"].reshape(1, O).astype(jnp.float32), (1, Op))

    def wspec(shape):                    # constant index_map -> weight resident in VMEM
        zeros = (0,) * len(shape)
        return pl.BlockSpec(shape, lambda i, s: zeros)

    cparams = pltpu.CompilerParams(
        dimension_semantics=("parallel", "arbitrary"),
        vmem_limit_bytes=vmem_limit,
    )

    if has_cells:
        # Split the head weight: rows [:H] see enc (repeated over C), rows [H:] see cells.
        w_head_enc = _pad_to(params["w_head"][:H].astype(matmul_dtype), (Hp, Op))
        w_head_cell = _pad_to(params["w_head"][H:].astype(matmul_dtype), (Dcp, Op))
        # (C, Bp, Dcp): batch sits on the sublane-aligned axis so all in-kernel reshapes /
        # broadcasts are free re-labels; the transpose back is a cheap wrapper-side XLA op.
        cells_t = jnp.swapaxes(_pad_to(cellstosort.astype(matmul_dtype), (Bp, C, Dcp)), 0, 1)

        out_t = pl.pallas_call(
            _fused_cells_kernel,
            out_shape=jax.ShapeDtypeStruct((C, Bp, Op), jnp.float32),
            grid_spec=pltpu.PrefetchScalarGridSpec(
                num_scalar_prefetch=0,
                grid=grid,
                in_specs=[
                    pl.BlockSpec((tb, ts, Fp), lambda i, s: (i, s, 0)),
                    pl.BlockSpec((tb, ts, 1), lambda i, s: (i, s, 0)),
                    pl.BlockSpec((C, tb, Dcp), lambda i, s: (0, i, 0)),
                    wspec((Fp, Hp)),
                    wspec((1, Hp)),
                    wspec((Hp, Op)),
                    wspec((Dcp, Op)),
                    wspec((1, Op)),
                ],
                out_specs=pl.BlockSpec((C, tb, Op), lambda i, s: (0, i, 0)),
                scratch_shapes=[pltpu.VMEM((tb, Hp), jnp.float32)],
            ),
            compiler_params=cparams,
        )(xc, mw3, cells_t, w_enc, b_enc, w_head_enc, w_head_cell, b_head)
        # (C, Bp, Op) -> (B, C, O) -> (B*C, O)   (row order b*C + c, as in the reference)
        return jnp.swapaxes(out_t, 0, 1)[:B, :, :O].reshape(B * C, O)

    # cellstosort is None: head acts directly on enc.
    w_head = _pad_to(params["w_head"].astype(matmul_dtype), (Hp, Op))
    out2 = pl.pallas_call(
        _fused_nocells_kernel,
        out_shape=jax.ShapeDtypeStruct((Bp, Op), jnp.float32),
        grid_spec=pltpu.PrefetchScalarGridSpec(
            num_scalar_prefetch=0,
            grid=grid,
            in_specs=[
                pl.BlockSpec((tb, ts, Fp), lambda i, s: (i, s, 0)),
                pl.BlockSpec((tb, ts, 1), lambda i, s: (i, s, 0)),
                wspec((Fp, Hp)),
                wspec((1, Hp)),
                wspec((Hp, Op)),
                wspec((1, Op)),
            ],
            out_specs=pl.BlockSpec((tb, Op), lambda i, s: (i, 0)),
            scratch_shapes=[pltpu.VMEM((tb, Hp), jnp.float32)],
        ),
        compiler_params=cparams,
    )(xc, mw3, w_enc, b_enc, w_head, b_head)
    return out2[:B, :O]


# ----------------------------- pure-JAX reference ----------------------------- #
def reference_forward(params, x, mask, cellstosort):
    z = jax.nn.gelu(jnp.einsum("bsf,fh->bsh", x, params["w_enc"]) + params["b_enc"])
    m = mask.astype(jnp.float32)
    enc = (z * m[:, :, None]).sum(1) / jnp.maximum(m.sum(1, keepdims=True), 1.0)
    C, Dc = cellstosort.shape[1], cellstosort.shape[-1]
    feat = jnp.concatenate(
        [jnp.repeat(enc, C, axis=0), cellstosort.reshape(-1, Dc)], axis=1
    )
    return feat @ params["w_head"] + params["b_head"]


# ------------------------------------ main ------------------------------------ #
if __name__ == "__main__":
    B, S, F = 2, 8, 16        # batch, sequence, input feature
    H = 32                    # encoder hidden
    C, Dc = 4, 16             # cells per sample, cell feature dim
    O = 8                     # head output dim

    key = jax.random.PRNGKey(0)
    k_x, k_c, k_w1, k_b1, k_w2, k_b2 = jax.random.split(key, 6)

    x = jax.random.normal(k_x, (B, S, F), jnp.float32)
    cellstosort = jax.random.normal(k_c, (B, C, Dc), jnp.float32)
    # deterministic mask: first sample fully valid, second masks out last 3 steps
    mask = jnp.stack(
        [jnp.ones((S,), jnp.float32),
         jnp.concatenate([jnp.ones((S - 3,), jnp.float32), jnp.zeros((3,), jnp.float32)])]
    )

    params = {
        "w_enc": jax.random.normal(k_w1, (F, H), jnp.float32) * 0.1,
        "b_enc": jax.random.normal(k_b1, (H,), jnp.float32) * 0.01,
        "w_head": jax.random.normal(k_w2, (H + Dc, O), jnp.float32) * 0.1,
        "b_head": jax.random.normal(k_b2, (O,), jnp.float32) * 0.01,
    }

    ref = reference_forward(params, x, mask, cellstosort)

    # --- f32 matmul-operand path ---
    out = headed_encoder_wrapper_forward(params, x, mask=mask, cellstosort=cellstosort)
    out = jax.block_until_ready(out)
    assert out.shape == (B * C, O), out.shape
    assert jnp.allclose(out, ref, atol=2e-3, rtol=2e-3), "f32 mismatch vs reference"

    # --- bf16 matmul operands (v5e/v6e/v7x MXU), f32 accumulation / elementwise ---
    out_bf16 = headed_encoder_wrapper_forward(
        params, x, mask=mask, cellstosort=cellstosort, matmul_dtype=jnp.bfloat16)
    out_bf16 = jax.block_until_ready(out_bf16)
    assert jnp.allclose(out_bf16, ref, atol=5e-2, rtol=5e-2), "bf16 mismatch vs reference"

    # --- no-cells / no-mask path: head applied directly to enc ---
    params_nc = dict(params, w_head=params["w_head"][:H])                 # (H, O) head
    out_nc = jax.block_until_ready(headed_encoder_wrapper_forward(params_nc, x))
    z = jax.nn.gelu(jnp.einsum("bsf,fh->bsh", x, params["w_enc"]) + params["b_enc"])
    ref_nc = z.mean(axis=1) @ params_nc["w_head"] + params["b_head"]
    assert out_nc.shape == (B, O), out_nc.shape
    assert jnp.allclose(out_nc, ref_nc, atol=2e-3, rtol=2e-3), "no-cells mismatch"

    print("KERNEL_OK")
</pallas_src>

<mosaic_0001>
module attributes {stable_mosaic.version = 11 : i64} {
  func.func @_fused_cells_kernel(%arg0: i32, %arg1: i32, %arg2: memref<8x16x128xf32, #tpu.memory_space<vmem>>, %arg3: memref<8x16x1xf32, #tpu.memory_space<vmem>>, %arg4: memref<4x8x128xf32, #tpu.memory_space<vmem>>, %arg5: memref<128x128xf32, #tpu.memory_space<vmem>>, %arg6: memref<1x128xf32, #tpu.memory_space<vmem>>, %arg7: memref<128x128xf32, #tpu.memory_space<vmem>>, %arg8: memref<128x128xf32, #tpu.memory_space<vmem>>, %arg9: memref<1x128xf32, #tpu.memory_space<vmem>>, %arg10: memref<4x8x128xf32, #tpu.memory_space<vmem>>, %arg11: memref<8x128xf32, #tpu.memory_space<vmem>>) attributes {dimension_semantics = [#tpu.dimension_semantics<parallel>, #tpu.dimension_semantics<arbitrary>], iteration_bounds = array<i64: 1, 1>, scalar_prefetch = 0 : i64, scratch_operands = 1 : i64, tpu.core_type = #tpu.core_type<tc>, window_params = [{transform_indices = @transform_0, window_bounds = array<i64: 8, 16, 128>}, {transform_indices = @transform_1, window_bounds = array<i64: 8, 16, 1>}, {transform_indices = @transform_2, window_bounds = array<i64: 4, 8, 128>}, {pipeline_mode = #tpu.pipeline_mode<synchronous>, transform_indices = @transform_3, window_bounds = array<i64: 128, 128>}, {pipeline_mode = #tpu.pipeline_mode<synchronous>, transform_indices = @transform_4, window_bounds = array<i64: 1, 128>}, {pipeline_mode = #tpu.pipeline_mode<synchronous>, transform_indices = @transform_5, window_bounds = array<i64: 128, 128>}, {pipeline_mode = #tpu.pipeline_mode<synchronous>, transform_indices = @transform_6, window_bounds = array<i64: 128, 128>}, {pipeline_mode = #tpu.pipeline_mode<synchronous>, transform_indices = @transform_7, window_bounds = array<i64: 1, 128>}, {transform_indices = @transform_8, window_bounds = array<i64: 4, 8, 128>}]} {
    %c0_i32 = arith.constant 0 : i32
    %0 = arith.cmpi eq, %arg1, %c0_i32 : i32
    %1 = arith.extui %0 : i1 to i32
    %c0_i32_0 = arith.constant 0 : i32
    %2 = arith.cmpi ne, %1, %c0_i32_0 : i32
    scf.if %2 {
      %cst_21 = arith.constant 0.000000e+00 : f32
      %34 = vector.broadcast %cst_21 : f32 to vector<8x128xf32>
      %c0_22 = arith.constant 0 : index
      %c0_23 = arith.constant 0 : index
      %35 = vector.load %arg11[%c0_22, %c0_23] : memref<8x128xf32, #tpu.memory_space<vmem>>, vector<8x128xf32>
      tpu.vector_store %arg11[%c0_22, %c0_23], %34 {strides = array<i32>} : memref<8x128xf32, #tpu.memory_space<vmem>>, vector<8x128xf32>,
    } else {
    }
    %c0 = arith.constant 0 : index
    %c0_1 = arith.constant 0 : index
    %c0_2 = arith.constant 0 : index
    %3 = vector.load %arg2[%c0, %c0_1, %c0_2] : memref<8x16x128xf32, #tpu.memory_space<vmem>>, vector<8x16x128xf32>
    %4 = vector.shape_cast %3 : vector<8x16x128xf32> to vector<128x128xf32>
    %c0_3 = arith.constant 0 : index
    %c0_4 = arith.constant 0 : index
    %5 = vector.load %arg5[%c0_3, %c0_4] : memref<128x128xf32, #tpu.memory_space<vmem>>, vector<128x128xf32>
    %cst = arith.constant dense<0.000000e+00> : vector<128x128xf32>
    %6 = tpu.matmul %4, %5, %cst {dimension_numbers = #tpu.dot_dimension_numbers<[1], [0], [0], [1], [0, 0, 1, 1], [], []>} : vector<128x128xf32>, vector<128x128xf32>, vector<128x128xf32> -> vector<128x128xf32>
    %c0_5 = arith.constant 0 : index
    %c0_6 = arith.constant 0 : index
    %7 = vector.load %arg6[%c0_5, %c0_6] : memref<1x128xf32, #tpu.memory_space<vmem>>, vector<1x128xf32>
    %8 = vector.broadcast %7 : vector<1x128xf32> to vector<128x128xf32>
    %9 = arith.addf %6, %8 : vector<128x128xf32>
    %10 = arith.mulf %9, %9 : vector<128x128xf32>
    %11 = arith.mulf %9, %10 : vector<128x128xf32>
    %cst_7 = arith.constant 4.471500e-02 : f32
    %12 = vector.broadcast %cst_7 : f32 to vector<128x128xf32>
    %13 = arith.mulf %12, %11 : vector<128x128xf32>
    %14 = arith.addf %9, %13 : vector<128x128xf32>
    %cst_8 = arith.constant 0.797884583 : f32
    %15 = vector.broadcast %cst_8 : f32 to vector<128x128xf32>
    %16 = arith.mulf %15, %14 : vector<128x128xf32>
    %17 = math.tanh %16 : vector<128x128xf32>
    %cst_9 = arith.constant 1.000000e+00 : f32
    %18 = vector.broadcast %cst_9 : f32 to vector<128x128xf32>
    %19 = arith.addf %18, %17 : vector<128x128xf32>
    %cst_10 = arith.constant 5.000000e-01 : f32
    %20 = vector.broadcast %cst_10 : f32 to vector<128x128xf32>
    %21 = arith.mulf %20, %19 : vector<128x128xf32>
    %22 = arith.mulf %9, %21 : vector<128x128xf32>
    %23 = vector.shape_cast %22 : vector<128x128xf32> to vector<8x16x128xf32>
    %c0_11 = arith.constant 0 : index
    %c0_12 = arith.constant 0 : index
    %c0_13 = arith.constant 0 : index
    %24 = vector.load %arg3[%c0_11, %c0_12, %c0_13] : memref<8x16x1xf32, #tpu.memory_space<vmem>>, vector<8x16x1xf32>
    %25 = vector.broadcast %24 : vector<8x16x1xf32> to vector<8x16x128xf32>
    %26 = arith.mulf %23, %25 : vector<8x16x128xf32>
    %c0_14 = arith.constant 0 : index
    %c0_15 = arith.constant 0 : index
    %27 = vector.load %arg11[%c0_14, %c0_15] : memref<8x128xf32, #tpu.memory_space<vmem>>, vector<8x128xf32>
    %cst_16 = arith.constant dense<0.000000e+00> : vector<8x128xf32>
    %28 = vector.multi_reduction <add>, %26, %cst_16 [1] : vector<8x16x128xf32> to vector<8x128xf32>
    %29 = arith.addf %27, %28 : vector<8x128xf32>
    %c0_17 = arith.constant 0 : index
    %c0_18 = arith.constant 0 : index
    %30 = vector.load %arg11[%c0_17, %c0_18] : memref<8x128xf32, #tpu.memory_space<vmem>>, vector<8x128xf32>
    tpu.vector_store %arg11[%c0_17, %c0_18], %29 {strides = array<i32>} : memref<8x128xf32, #tpu.memory_space<vmem>>, vector<8x128xf32>,
    %c0_i32_19 = arith.constant 0 : i32
    %31 = arith.cmpi eq, %arg1, %c0_i32_19 : i32
    %32 = arith.extui %31 : i1 to i32
    %c0_i32_20 = arith.constant 0 : i32
    %33 = arith.cmpi ne, %32, %c0_i32_20 : i32
    scf.if %33 {
      %c0_21 = arith.constant 0 : index
      %c0_22 = arith.constant 0 : index
      %34 = vector.load %arg11[%c0_21, %c0_22] : memref<8x128xf32, #tpu.memory_space<vmem>>, vector<8x128xf32>
      %c0_23 = arith.constant 0 : index
      %c0_24 = arith.constant 0 : index
      %35 = vector.load %arg7[%c0_23, %c0_24] : memref<128x128xf32, #tpu.memory_space<vmem>>, vector<128x128xf32>
      %cst_25 = arith.constant dense<0.000000e+00> : vector<8x128xf32>
      %36 = tpu.matmul %34, %35, %cst_25 {dimension_numbers = #tpu.dot_dimension_numbers<[1], [0], [0], [1], [0, 0, 1, 1], [], []>} : vector<8x128xf32>, vector<128x128xf32>, vector<8x128xf32> -> vector<8x128xf32>
      %c0_26 = arith.constant 0 : index
      %c0_27 = arith.constant 0 : index
      %37 = vector.load %arg9[%c0_26, %c0_27] : memref<1x128xf32, #tpu.memory_space<vmem>>, vector<1x128xf32>
      %38 = vector.broadcast %37 : vector<1x128xf32> to vector<8x128xf32>
      %39 = arith.addf %36, %38 : vector<8x128xf32>
      %c0_28 = arith.constant 0 : index
      %c0_29 = arith.constant 0 : index
      %c0_30 = arith.constant 0 : index
      %40 = vector.load %arg4[%c0_28, %c0_29, %c0_30] : memref<4x8x128xf32, #tpu.memory_space<vmem>>, vector<4x8x128xf32>
      %41 = vector.shape_cast %40 : vector<4x8x128xf32> to vector<32x128xf32>
      %c0_31 = arith.constant 0 : index
      %c0_32 = arith.constant 0 : index
      %42 = vector.load %arg8[%c0_31, %c0_32] : memref<128x128xf32, #tpu.memory_space<vmem>>, vector<128x128xf32>
      %cst_33 = arith.constant dense<0.000000e+00> : vector<32x128xf32>
      %43 = tpu.matmul %41, %42, %cst_33 {dimension_numbers = #tpu.dot_dimension_numbers<[1], [0], [0], [1], [0, 0, 1, 1], [], []>} : vector<32x128xf32>, vector<128x128xf32>, vector<32x128xf32> -> vector<32x128xf32>
      %44 = vector.shape_cast %43 : vector<32x128xf32> to vector<4x8x128xf32>
      %45 = vector.shape_cast %39 : vector<8x128xf32> to vector<1x8x128xf32>
      %46 = vector.broadcast %45 : vector<1x8x128xf32> to vector<4x8x128xf32>
      %47 = arith.addf %44, %46 : vector<4x8x128xf32>
      %c0_34 = arith.constant 0 : index
      %c0_35 = arith.constant 0 : index
      %c0_36 = arith.constant 0 : index
      %48 = vector.load %arg10[%c0_34, %c0_35, %c0_36] : memref<4x8x128xf32, #tpu.memory_space<vmem>>, vector<4x8x128xf32>
      tpu.vector_store %arg10[%c0_34, %c0_35, %c0_36], %47 {strides = array<i32>} : memref<4x8x128xf32, #tpu.memory_space<vmem>>, vector<4x8x128xf32>,
    } else {
    }
    return
  }
  func.func @transform_0(%arg0: i32, %arg1: i32) -> (i32, i32, i32) {
    %c0_i32 = arith.constant 0 : i32
    %c0_i32_0 = arith.constant 0 : i32
    return %arg0, %arg1, %c0_i32 : i32, i32, i32
  }
  func.func @transform_1(%arg0: i32, %arg1: i32) -> (i32, i32, i32) {
    %c0_i32 = arith.constant 0 : i32
    %c0_i32_0 = arith.constant 0 : i32
    return %arg0, %arg1, %c0_i32 : i32, i32, i32
  }
  func.func @transform_2(%arg0: i32, %arg1: i32) -> (i32, i32, i32) {
    %c0_i32 = arith.constant 0 : i32
    %c0_i32_0 = arith.constant 0 : i32
    %c0_i32_1 = arith.constant 0 : i32
    return %c0_i32, %arg0, %c0_i32_0 : i32, i32, i32
  }
  func.func @transform_3(%arg0: i32, %arg1: i32) -> (i32, i32) {
    %c0_i32 = arith.constant 0 : i32
    %c0_i32_0 = arith.constant 0 : i32
    %c0_i32_1 = arith.constant 0 : i32
    return %c0_i32, %c0_i32_0 : i32, i32
  }
  func.func @transform_4(%arg0: i32, %arg1: i32) -> (i32, i32) {
    %c0_i32 = arith.constant 0 : i32
    %c0_i32_0 = arith.constant 0 : i32
    %c0_i32_1 = arith.constant 0 : i32
    return %c0_i32, %c0_i32_0 : i32, i32
  }
  func.func @transform_5(%arg0: i32, %arg1: i32) -> (i32, i32) {
    %c0_i32 = arith.constant 0 : i32
    %c0_i32_0 = arith.constant 0 : i32
    %c0_i32_1 = arith.constant 0 : i32
    return %c0_i32, %c0_i32_0 : i32, i32
  }
  func.func @transform_6(%arg0: i32, %arg1: i32) -> (i32, i32) {
    %c0_i32 = arith.constant 0 : i32
    %c0_i32_0 = arith.constant 0 : i32
    %c0_i32_1 = arith.constant 0 : i32
    return %c0_i32, %c0_i32_0 : i32, i32
  }
  func.func @transform_7(%arg0: i32, %arg1: i32) -> (i32, i32) {
    %c0_i32 = arith.constant 0 : i32
    %c0_i32_0 = arith.constant 0 : i32
    %c0_i32_1 = arith.constant 0 : i32
    return %c0_i32, %c0_i32_0 : i32, i32
  }
  func.func @transform_8(%arg0: i32, %arg1: i32) -> (i32, i32, i32) {
    %c0_i32 = arith.constant 0 : i32
    %c0_i32_0 = arith.constant 0 : i32
    %c0_i32_1 = arith.constant 0 : i32
    return %c0_i32, %arg0, %c0_i32_0 : i32, i32, i32
  }
}

</mosaic_0001>

<bundles_post_ra>
// kernel: tpu_custom_call.1
= control target key start
LH: loop header
LB: loop body
LE: loop exit
PB: predicated region body
PF: predicated region fallthrough
CT: control target
= control target key end

     0   :  { %13 = vsyncpa [#allocation4], 0  ;;  %s1209_s0 = inlined_call_operand.vmem [shape: f32[8,16,128], index: 0, kind: input, shape index: {}]   ;;  %s1210_s1 = inlined_call_operand.vmem [shape: f32[8,16,1], index: 1, kind: input, shape index: {}]   ;;  %s1211_s2 = inlined_call_operand.hbm [shape: f32[4,8,128], index: 2, kind: input, shape index: {}]   ;;  %s1212_s3 = inlined_call_operand.hbm [shape: f32[128,128], index: 3, kind: input, shape index: {}]   ;;  %s1213_s4 = inlined_call_operand.vmem [shape: f32[1,128], index: 4, kind: input, shape index: {}]   ;;  %s1214_s5 = inlined_call_operand.hbm [shape: f32[128,128], index: 5, kind: input, shape index: {}]   ;;  %s1215_s6 = inlined_call_operand.hbm [shape: f32[128,128], index: 6, kind: input, shape index: {}]   ;;  %s1216_s7 = inlined_call_operand.vmem [shape: f32[1,128], index: 7, kind: input, shape index: {}]   ;;  %s1217_s8 = inlined_call_operand.hbm [shape: f32[4,8,128], index: 8, kind: output, shape index: {}]  }
   0x1   :  { %14 = vsyncpa [#allocation7], 0 }
   0x2   :  { %15 = vsyncpa [#allocation10], 0 }
   0x3   :  { %16 = vsyncpa [#allocation5], 0  ;;  %s38_s29 = sshll.u32 %s1212_s3, 4  ;;  %s864_s30 = smov [#allocation6]   ;;  %s39_s29 = int_to_ptr.hbm [resolvable:$true] %s38_s29 }
   0x4   :  { %s40_s9 = sshll.u32 %s864_s30, 4  ;;  %s25_s12 = sshll.u32 %s1211_s2, 4  ;;  %s41_s9 = int_to_ptr.vmem [resolvable:$true] %s40_s9  ;;  %s26_s12 = int_to_ptr.hbm [resolvable:$true] %s25_s12 }
   0x5   :  { %s865_s13 = smov 128   ;;  %s866_s14 = smov 8  }
   0x6   :  { %46 = dma.hbm_to_vmem [thread:$0]  %s39_s29, 2048, %s41_s9, [#allocation7], %s865_s13, %s865_s13, %s866_s14  }
   0x7   :  { %s867_s15 = smov [#allocation3]   ;;  %s53_s3 = sshll.u32 %s1214_s5, 4  ;;  %s54_s3 = int_to_ptr.hbm [resolvable:$true] %s53_s3 }
   0x8   :  { %s27_s16 = sshll.u32 %s867_s15, 4  ;;  %s66_s20 = sshll.u32 %s1215_s6, 4  ;;  %s28_s16 = int_to_ptr.vmem [resolvable:$true] %s27_s16  ;;  %s67_s20 = int_to_ptr.hbm [resolvable:$true] %s66_s20 }
   0x9   :  { %33 = dma.hbm_to_vmem [thread:$0]  %s26_s12, 512, %s28_s16, [#allocation4], %s865_s13, %s865_s13, %s866_s14  }
   0xa   :  { %s868_s21 = smov [#allocation8]   ;;  %s869_s23 = smov [#allocation9]  }
   0xb   :  { %s55_s22 = sshll.u32 %s868_s21, 4  ;;  %s68_s5 = sshll.u32 %s869_s23, 4  ;;  %s56_s22 = int_to_ptr.vmem [resolvable:$true] %s55_s22  ;;  %s69_s5 = int_to_ptr.vmem [resolvable:$true] %s68_s5 }
   0xc   :  { %61 = dma.hbm_to_vmem [thread:$0]  %s54_s3, 2048, %s56_s22, [#allocation7], %s865_s13, %s865_s13, %s866_s14  }
   0xd   :  { %74 = dma.hbm_to_vmem [thread:$0]  %s67_s20, 2048, %s69_s5, [#allocation10], %s865_s13, %s865_s13, %s866_s14  }
   0xe   :  { %856 = dma.done.wait [#allocation4], 512  }
   0xf   :  { %857 = vsyncadd [#allocation4], 4294966784 }
  0x10   :  { %858 = dma.done.wait [#allocation7], 4096  }
  0x11   :  { %859 = vsyncadd [#allocation7], 4294963200 }
  0x12   :  { %860 = dma.done.wait [#allocation10], 2048  }
  0x13   :  { %861 = vsyncadd [#allocation10], 4294965248  ;;  %v129_v0 = vld [vmem:[#allocation6 + $0x78] sm:$0xff]  ;;  %v128_v1 = vld [vmem:[#allocation6 + $0x70] sm:$0xff]  ;;  %v870_v3 = vmov 0   ;;  %vm520_vm0 = vcmask 1041409  }
  0x14   :  { %134 = vmatpush.msra.mxu0 %v129_v0  ;;  %659 = vmatpush.msra.mxu1 %v129_v0  ;;  %v127_v2 = vld [vmem:[#allocation6 + $0x68] sm:$0xff]  ;;  %v126_v4 = vld [vmem:[#allocation6 + $0x60] sm:$0xff]  ;;  %v125_v5 = vld [vmem:[#allocation6 + $0x58] sm:$0xff]  ;;  %vm522_vm1 = vcmask 1042434   ;;  %vm524_vm2 = vcmask 1043459   ;;  %vm526_vm3 = vcmask 1044484  }
  0x15   :  { %660 = vmatpush.msra.mxu3 %v129_v0  ;;  %699 = vset.pattern.permute.xlu0 %v870_v3  ;;  %v343_v6 = vld [vmem:[%s1210_s1] sm:$0xff]  ;;  %v124_v7 = vld [vmem:[#allocation6 + $0x50] sm:$0xff]  ;;  %v123_v8 = vld [vmem:[#allocation6 + $0x48] sm:$0xff]  ;;  %vm528_vm4 = vcmask 1045509   ;;  %vm530_vm5 = vcmask 1046534   ;;  %vm532_vm6 = vcmask 1047559  }
  0x16   :  { %135 = vmatpush.msra.mxu0 %v128_v1  ;;  %661 = vmatpush.msra.mxu1 %v128_v1  ;;  %v122_v9 = vld [vmem:[#allocation6 + $0x40] sm:$0xff]  ;;  %v344_v10 = vld [vmem:[%s1210_s1 + $0x8] sm:$0xff]  ;;  %v121_v11 = vld [vmem:[#allocation6 + $0x38] sm:$0xff]  ;;  %s644_s22 = sshll.u32 %s1217_s8, 4  ;;  %s645_s22 = int_to_ptr.hbm [resolvable:$true] %s644_s22 }
  0x17   :  { %662 = vmatpush.msra.mxu3 %v128_v1  ;;  %700 = vset.pattern.permute.xlu1 %v870_v3  ;;  %v120_v12 = vld [vmem:[#allocation6 + $0x30] sm:$0xff]  ;;  %v119_v14 = vld [vmem:[#allocation6 + $0x28] sm:$0xff]  ;;  %v118_v15 = vld [vmem:[#allocation6 + $0x20] sm:$0xff] }
  0x18   :  { %136 = vmatpush.msra.mxu0 %v127_v2  ;;  %663 = vmatpush.msra.mxu1 %v127_v2  ;;  %v345_v13 = vld [vmem:[%s1210_s1 + $0x10] sm:$0xff]  ;;  %v117_v17 = vld [vmem:[#allocation6 + $0x18] sm:$0xff]  ;;  %v115_v20 = vld [vmem:[#allocation6 + $0x8] sm:$0xff] }
  0x19   :  { %664 = vmatpush.msra.mxu3 %v127_v2  ;;  %701 = vset.pattern.permute.xlu2 %v870_v3  ;;  %v349_v16 = vld [vmem:[%s1210_s1 + $0x30] sm:$0xff]  ;;  %v346_v19 = vld [vmem:[%s1210_s1 + $0x18] sm:$0xff]  ;;  %v114_v21 = vld [vmem:[#allocation6] sm:$0xff] }
  0x1a   :  { %137 = vmatpush.msra.mxu0 %v126_v4  ;;  %665 = vmatpush.msra.mxu1 %v126_v4  ;;  %v116_v18 = vld [vmem:[#allocation6 + $0x10] sm:$0xff]  ;;  %v98_v22 = vld [vmem:[%s1209_s0] sm:$0xff]  ;;  %v352_v25 = vld [vmem:[%s1210_s1 + $0x48] sm:$0xff] }
  0x1b   :  { %666 = vmatpush.msra.mxu3 %v126_v4  ;;  %361 = vperm.xlu0 %699, %v343_v6   ;;  %v104_v23 = vld [vmem:[%s1209_s0 + $0x30] sm:$0xff]  ;;  %v350_v26 = vld [vmem:[%s1210_s1 + $0x38] sm:$0xff]  ;;  %v99_v27 = vld [vmem:[%s1209_s0 + $0x8] sm:$0xff] }
  0x1c   :  { %138 = vmatpush.msra.mxu0 %v125_v5  ;;  %667 = vmatpush.msra.mxu1 %v125_v5  ;;  %v108_v24 = vld [vmem:[%s1209_s0 + $0x50] sm:$0xff]  ;;  %v105_v28 = vld [vmem:[%s1209_s0 + $0x38] sm:$0xff]  ;;  %v355_v30 = vld [vmem:[%s1210_s1 + $0x60] sm:$0xff] }
  0x1d   :  { %668 = vmatpush.msra.mxu3 %v125_v5  ;;  %371 = vperm.xlu1 %700, %v345_v13   ;;  %v109_v29 = vld [vmem:[%s1209_s0 + $0x58] sm:$0xff]  ;;  %v353_v31 = vld [vmem:[%s1210_s1 + $0x50] sm:$0xff]  ;;  %v347_v32 = vld [vmem:[%s1210_s1 + $0x20] sm:$0xff] }
  0x1e   :  { %139 = vmatpush.msra.mxu0 %v124_v7  ;;  %669 = vmatpush.msra.mxu1 %v124_v7  ;;  %v100_v33 = vld [vmem:[%s1209_s0 + $0x10] sm:$0xff]  ;;  %v106_v34 = vld [vmem:[%s1209_s0 + $0x40] sm:$0xff]  ;;  %v358_v36 = vld [vmem:[%s1210_s1 + $0x78] sm:$0xff] }
  0x1f   :  { %670 = vmatpush.msra.mxu3 %v124_v7  ;;  %381 = vperm.xlu2 %701, %v347_v32   ;;  %v110_v35 = vld [vmem:[%s1209_s0 + $0x60] sm:$0xff]  ;;  %v356_v37 = vld [vmem:[%s1210_s1 + $0x68] sm:$0xff]  ;;  %v101_v39 = vld [vmem:[%s1209_s0 + $0x18] sm:$0xff] }
  0x20   :  { %140 = vmatpush.msra.mxu0 %v123_v8  ;;  %671 = vmatpush.msra.mxu1 %v123_v8  ;;  %v348_v38 = vld [vmem:[%s1210_s1 + $0x28] sm:$0xff]  ;;  %v351_v42 = vld [vmem:[%s1210_s1 + $0x40] sm:$0xff]  ;;  %v112_v44 = vld [vmem:[%s1209_s0 + $0x70] sm:$0xff] }
  0x21   :  { %672 = vmatpush.msra.mxu3 %v123_v8  ;;  %v107_v40 = vld [vmem:[%s1209_s0 + $0x48] sm:$0xff]  ;;  %v102_v43 = vld [vmem:[%s1209_s0 + $0x20] sm:$0xff]  ;;  %v354_v45 = vld [vmem:[%s1210_s1 + $0x58] sm:$0xff] }
  0x22   :  { %141 = vmatpush.msra.mxu0 %v122_v9  ;;  %673 = vmatpush.msra.mxu1 %v122_v9  ;;  %v111_v41 = vld [vmem:[%s1209_s0 + $0x68] sm:$0xff]  ;;  %v113_v47 = vld [vmem:[%s1209_s0 + $0x78] sm:$0xff]  ;;  %v357_v48 = vld [vmem:[%s1210_s1 + $0x70] sm:$0xff] }
  0x23   :  { %674 = vmatpush.msra.mxu3 %v122_v9  ;;  %366 = vperm.xlu0 %699, %v344_v10   ;;  %v103_v46 = vld [vmem:[%s1209_s0 + $0x28] sm:$0xff]  ;;  %v600_v49 = vld [vmem:[#allocation9 + $0x78] sm:$0xff]  ;;  %v1040_v52 = vld [vmem:[%s1213_s4] ss:$0 sm:$0xff]  ;;  %s871_s4 = smov [#allocation11]  }
  0x24   :  { %142 = vmatpush.msra.mxu0 %v121_v11  ;;  %675 = vmatpush.msra.mxu1 %v121_v11  ;;  %v599_v53 = vld [vmem:[#allocation9 + $0x70] sm:$0xff]  ;;  %v598_v54 = vld [vmem:[#allocation9 + $0x68] sm:$0xff]  ;;  %v597_v58 = vld [vmem:[#allocation9 + $0x60] sm:$0xff]  ;;  %s642_s19 = sshll.u32 %s871_s4, 4  ;;  %s643_s19 = int_to_ptr.vmem [resolvable:$true] %s642_s19 }
  0x25   :  { %676 = vmatpush.msra.mxu3 %v121_v11  ;;  %376 = vperm.xlu1 %700, %v346_v19   ;;  %v596_v62 = vld [vmem:[#allocation9 + $0x58] sm:$0xff]  ;;  %v595_v7 = vld [vmem:[#allocation9 + $0x50] sm:$0xff]  ;;  %v594_v13 = vld [vmem:[#allocation9 + $0x48] sm:$0xff] }
  0x26   :  { %143 = vmatpush.msra.mxu0 %v120_v12  ;;  %677 = vmatpush.msra.mxu1 %v120_v12  ;;  %v593_v19 = vld [vmem:[#allocation9 + $0x40] sm:$0xff] }
  0x27   :  { %678 = vmatpush.msra.mxu3 %v120_v12  ;;  %386 = vperm.xlu2 %701, %v348_v38  }
  0x28   :  { %144 = vmatpush.msra.mxu0 %v119_v14  ;;  %679 = vmatpush.msra.mxu1 %v119_v14 }
  0x29   :  { %680 = vmatpush.msra.mxu3 %v119_v14  ;;  %601 = vmatpush.msra.mxu2 %v600_v49 }
  0x2a   :  { %145 = vmatpush.msra.mxu0 %v118_v15  ;;  %681 = vmatpush.msra.mxu1 %v118_v15 }
  0x2b   :  { %682 = vmatpush.msra.mxu3 %v118_v15  ;;  %391 = vperm.xlu0 %699, %v349_v16  }
  0x2c   :  { %146 = vmatpush.msra.mxu0 %v117_v17  ;;  %683 = vmatpush.msra.mxu1 %v117_v17 }
  0x2d   :  { %684 = vmatpush.msra.mxu3 %v117_v17  ;;  %396 = vperm.xlu1 %700, %v350_v26  }
  0x2e   :  { %147 = vmatpush.msra.mxu0 %v116_v18  ;;  %685 = vmatpush.msra.mxu1 %v116_v18 }
  0x2f   :  { %686 = vmatpush.msra.mxu3 %v116_v18  ;;  %401 = vperm.xlu2 %701, %v351_v42  }
  0x30   :  { %148 = vmatpush.msra.mxu0 %v115_v20  ;;  %687 = vmatpush.msra.mxu1 %v115_v20 }
  0x31   :  { %688 = vmatpush.msra.mxu3 %v115_v20  ;;  %602 = vmatpush.msra.mxu2 %v599_v53 }
  0x32   :  { %149 = vmatpush.msra.mxu0 %v114_v21  ;;  %689 = vmatpush.msra.mxu1 %v114_v21 }
  0x33   :  { %690 = vmatpush.msra.mxu3 %v114_v21  ;;  %150 = vmatmul.f32.vlgmr.msra.gmra.mxu0 %v98_v22 }
  0x34   :  { %168 = vmatmul.f32.vlgmr.msra.gmra.mxu1 %v104_v23  ;;  %180 = vmatmul.f32.vlgmr.msra.gmra.mxu3 %v108_v24  ;;  %v592_v24 = vld [vmem:[#allocation9 + $0x38] sm:$0xff] }
  0x35   :  { %406 = vperm.xlu0 %699, %v352_v25   ;;  %411 = vperm.xlu1 %700, %v353_v31  }
  0x36   :  { %603 = vmatpush.msra.mxu2 %v598_v54 }
  0x37   :  { %416 = vperm.xlu2 %701, %v354_v45  }
  0x38   :  { %604 = vmatpush.msra.mxu2 %v597_v58 }
  0x3a   :  { %605 = vmatpush.msra.mxu2 %v596_v62  ;;  %v588_v62 = vld [vmem:[#allocation9 + $0x18] sm:$0xff] }
  0x3b   :  { %153 = vmatmul.f32.gmra.mxu0 %v99_v27 }
  0x3c   :  { %171 = vmatmul.f32.gmra.mxu1 %v105_v28  ;;  %183 = vmatmul.f32.gmra.mxu3 %v109_v29 }
  0x3d   :  { %421 = vperm.xlu0 %699, %v355_v30   ;;  %426 = vperm.xlu1 %700, %v356_v37  }
  0x3e   :  { %606 = vmatpush.msra.mxu2 %v595_v7 }
  0x3f   :  { %431 = vperm.xlu2 %701, %v357_v48  }
  0x40   :  { %607 = vmatpush.msra.mxu2 %v594_v13 }
  0x42   :  { %608 = vmatpush.msra.mxu2 %v593_v19 }
  0x43   :  { %156 = vmatmul.f32.gmra.mxu0 %v100_v33  ;;  %v591_v33 = vld [vmem:[#allocation9 + $0x30] sm:$0xff] }
  0x44   :  { %174 = vmatmul.f32.gmra.mxu1 %v106_v34  ;;  %186 = vmatmul.f32.gmra.mxu3 %v110_v35 }
  0x45   :  { %436 = vperm.xlu0 %699, %v358_v36   ;;  %609 = vmatpush.msra.mxu2 %v592_v24 }
  0x47   :  { %610 = vmatpush.msra.mxu2 %v591_v33 }
  0x4b   :  { %159 = vmatmul.f32.gmra.mxu0 %v101_v39 }
  0x4c   :  { %177 = vmatmul.f32.gmra.mxu1 %v107_v40  ;;  %189 = vmatmul.f32.gmra.mxu3 %v111_v41 }
  0x53   :  { %162 = vmatmul.f32.gmra.mxu0 %v102_v43  ;;  %v590_v43 = vld [vmem:[#allocation9 + $0x28] sm:$0xff] }
  0x54   :  { %192 = vmatmul.f32.gmra.mxu3 %v112_v44  ;;  %611 = vmatpush.msra.mxu2 %v590_v43 }
  0x5b   :  { %165 = vmatmul.f32.gmra.mxu0 %v103_v46 }
  0x5c   :  { %195 = vmatmul.f32.gmra.mxu3 %v113_v47 }
  0x8d   :  { %v1093_v34 = vpop.permute.xlu0 %361 }
  0x8f   :  { %v1086_v29 = vpop.permute.xlu1 %371 }
  0x95   :  { %v1132_v24 = vpop.permute.xlu0 %366 }
  0xb0   :  { %v151_v50 = vpop.f32.mrf.mxu0 }
  0xb1   :  { %v169_v51 = vpop.f32.mrf.mxu1  ;;  %v1043_v56 = vadd.f32 %v1040_v52, %v151_v50  ;;  %v589_v50 = vld [vmem:[#allocation9 + $0x20] sm:$0xff] }
  0xb2   :  { %v1046_v59 = vadd.f32 %v1040_v52, %v169_v51  ;;  %612 = vmatpush.msra.mxu2 %v589_v50  ;;  %v553_v50 = vld [vmem:[#allocation8 + $0x60] sm:$0xff] }
  0xb3   :  { %v199_v0 = vmul.f32 %v1043_v56, %v1043_v56 }
  0xb4   :  { %v205_v1 = vmul.f32 %v1046_v59, %v1046_v59  ;;  %613 = vmatpush.msra.mxu2 %v588_v62 }
  0xb5   :  { %v215_v5 = vmul.f32 %v199_v0, %v1043_v56 }
  0xb6   :  { %v221_v8 = vmul.f32 %v205_v1, %v1046_v59 }
  0xb7   :  { %v181_v55 = vpop.f32.mrf.mxu3  ;;  %v231_v17 = vmul.f32 0.044715, %v215_v5 }
  0xb8   :  { %v154_v57 = vpop.f32.mrf.mxu0  ;;  %v1065_v9 = vadd.f32 %v1040_v52, %v181_v55  ;;  %v237_v20 = vmul.f32 0.044715, %v221_v8  ;;  %v587_v8 = vld [vmem:[#allocation9 + $0x10] sm:$0xff] }
  0xb9   :  { %v172_v60 = vpop.f32.mrf.mxu1  ;;  %v1049_v61 = vadd.f32 %v1040_v52, %v154_v57  ;;  %v247_v28 = vadd.f32 %v231_v17, %v1043_v56  ;;  %614 = vmatpush.msra.mxu2 %v587_v8  ;;  %v1127_v17 = vpop.permute.xlu1 %376 }
  0xba   :  { %v1052_v63 = vadd.f32 %v1040_v52, %v172_v60  ;;  %v209_v21 = vmul.f32 %v1065_v9, %v1065_v9  ;;  %v253_v36 = vadd.f32 %v237_v20, %v1046_v59 }
  0xbb   :  { %v200_v2 = vmul.f32 %v1049_v61, %v1049_v61  ;;  %v263_v47 = vmul.f32 0.7978846, %v247_v28 }
  0xbc   :  { %v206_v3 = vmul.f32 %v1052_v63, %v1052_v63  ;;  %v225_v35 = vmul.f32 %v209_v21, %v1065_v9  ;;  %v269_v55 = vmul.f32 0.7978846, %v253_v36  ;;  %v581_v36 = vld [vmem:[#allocation3] sm:$0xff] }
  0xbd   :  { %v216_v12 = vmul.f32 %v200_v2, %v1049_v61  ;;  %704 = vtanh.f32 %v263_v47 }
  0xbe   :  { %v222_v14 = vmul.f32 %v206_v3, %v1052_v63  ;;  %v241_v51 = vmul.f32 0.044715, %v225_v35  ;;  %706 = vtanh.f32 %v269_v55 }
  0xbf   :  { %v184_v4 = vpop.f32.mrf.mxu3  ;;  %v232_v22 = vmul.f32 0.044715, %v216_v12 }
  0xc0   :  { %v157_v6 = vpop.f32.mrf.mxu0  ;;  %v1073_v15 = vadd.f32 %v1040_v52, %v184_v4  ;;  %v238_v25 = vmul.f32 0.044715, %v222_v14  ;;  %v257_v14 = vadd.f32 %v241_v51, %v1065_v9 }
  0xc1   :  { %v1068_v10 = vadd.f32 %v1040_v52, %v157_v6  ;;  %v175_v11 = vpop.f32.mrf.mxu1  ;;  %v248_v39 = vadd.f32 %v232_v22, %v1049_v61  ;;  %v556_v22 = vld [vmem:[#allocation8 + $0x78] sm:$0xff] }
  0xc2   :  { %v1078_v18 = vadd.f32 %v1040_v52, %v175_v11  ;;  %v210_v26 = vmul.f32 %v1073_v15, %v1073_v15  ;;  %v254_v45 = vadd.f32 %v238_v25, %v1052_v63  ;;  %v1120_v11 = vpop.permute.xlu2 %381  ;;  %561 = vmatpush.msrb.mxu1 %v556_v22  ;;  %v273_v35 = vmul.f32 0.7978846, %v257_v14 }
  0xc3   :  { %v201_v16 = vmul.f32 %v1068_v10, %v1068_v10  ;;  %v264_v57 = vmul.f32 0.7978846, %v248_v39 }
  0xc4   :  { %v207_v30 = vmul.f32 %v1078_v18, %v1078_v18  ;;  %v226_v44 = vmul.f32 %v210_v26, %v1073_v15  ;;  %v270_v1 = vmul.f32 0.7978846, %v254_v45 }
  0xc5   :  { %v217_v23 = vmul.f32 %v201_v16, %v1068_v10  ;;  %708 = vtanh.f32 %v264_v57 }
  0xc6   :  { %v223_v48 = vmul.f32 %v207_v30, %v1078_v18  ;;  %v242_v0 = vmul.f32 0.044715, %v226_v44  ;;  %710 = vtanh.f32 %v270_v1  ;;  %v555_v30 = vld [vmem:[#allocation8 + $0x70] sm:$0xff]  ;;  %v1147_v1 = vpop.permute.xlu1 %396 }
  0xc7   :  { %v187_v27 = vpop.f32.mrf.mxu3  ;;  %v233_v40 = vmul.f32 0.044715, %v217_v23  ;;  %v586_v23 = vld [vmem:[#allocation9 + $0x8] sm:$0xff]  ;;  %562 = vmatpush.msrb.mxu1 %v555_v30  ;;  %v549_v30 = vld [vmem:[#allocation8 + $0x40] sm:$0xff] }
  0xc8   :  { %v1091_v31 = vadd.f32 %v1040_v52, %v187_v27  ;;  %v160_v32 = vpop.f32.mrf.mxu0  ;;  %v239_v4 = vmul.f32 0.044715, %v223_v48  ;;  %v258_v26 = vadd.f32 %v242_v0, %v1073_v15  ;;  %615 = vmatpush.msra.mxu2 %v586_v23 }
  0xc9   :  { %v1098_v37 = vadd.f32 %v1040_v52, %v160_v32  ;;  %v178_v38 = vpop.f32.mrf.mxu1  ;;  %v249_v58 = vadd.f32 %v233_v40, %v1068_v10  ;;  %v585_v32 = vld [vmem:[#allocation9] sm:$0xff] }
  0xca   :  { %v211_v41 = vmul.f32 %v1091_v31, %v1091_v31  ;;  %v1104_v42 = vadd.f32 %v1040_v52, %v178_v38  ;;  %v255_v28 = vadd.f32 %v239_v4, %v1078_v18  ;;  %616 = vmatpush.msra.mxu2 %v585_v32  ;;  %v705_v38 = vpop.eup %704  ;;  %v274_v43 = vmul.f32 0.7978846, %v258_v26  ;;  %v1145_v62 = vpop.permute.xlu2 %386  ;;  %v551_v4 = vld [vmem:[#allocation8 + $0x50] sm:$0xff] }
  0xcb   :  { %v202_v46 = vmul.f32 %v1098_v37, %v1098_v37  ;;  %v265_v19 = vmul.f32 0.7978846, %v249_v58  ;;  %617 = vmatmul.f32.vlgmr.msra.gmra.mxu2 %v581_v36  ;;  %v552_v58 = vld [vmem:[#allocation8 + $0x58] sm:$0xff] }
  0xcc   :  { %v208_v49 = vmul.f32 %v1104_v42, %v1104_v42  ;;  %v227_v53 = vmul.f32 %v211_v41, %v1091_v31  ;;  %v554_v41 = vld [vmem:[#allocation8 + $0x68] sm:$0xff]  ;;  %v271_v47 = vmul.f32 0.7978846, %v255_v28 }
  0xcd   :  { %v218_v54 = vmul.f32 %v202_v46, %v1098_v37  ;;  %563 = vmatpush.msrb.mxu1 %v554_v41  ;;  %v707_v46 = vpop.eup %706 }
  0xce   :  { %v224_v60 = vmul.f32 %v208_v49, %v1104_v42  ;;  %v243_v12 = vmul.f32 0.044715, %v227_v53  ;;  %v709_v51 = vpop.eup %708  ;;  %v301_v8 = vadd.f32 1.0, %v707_v46 }
  0xcf   :  { %v234_v2 = vmul.f32 0.044715, %v218_v54  ;;  %v190_v3 = vpop.f32.mrf.mxu3  ;;  %564 = vmatpush.msrb.mxu1 %v553_v50  ;;  %v711_v54 = vpop.eup %710 }
  0xd0   :  { %v240_v5 = vmul.f32 0.044715, %v224_v60  ;;  %v1118_v6 = vadd.f32 %v1040_v52, %v190_v3  ;;  %v163_v7 = vpop.f32.mrf.mxu0  ;;  %v259_v33 = vadd.f32 %v243_v12, %v1091_v31  ;;  %v302_v23 = vadd.f32 1.0, %v711_v54 }
  0xd1   :  { %v250_v13 = vadd.f32 %v234_v2, %v1098_v37  ;;  %v1125_v16 = vadd.f32 %v1040_v52, %v163_v7  ;;  %565 = vmatpush.msrb.mxu1 %v552_v58  ;;  %v1151_v7 = vpop.permute.xlu0 %391  ;;  %v547_v58 = vld [vmem:[#allocation8 + $0x30] sm:$0xff] }
  0xd2   :  { %v256_v20 = vadd.f32 %v240_v5, %v1104_v42  ;;  %v212_v21 = vmul.f32 %v1118_v6, %v1118_v6  ;;  %v275_v53 = vmul.f32 0.7978846, %v259_v33  ;;  %v295_v5 = vadd.f32 1.0, %v705_v38 }
  0xd3   :  { %v266_v25 = vmul.f32 0.7978846, %v250_v13  ;;  %v203_v27 = vmul.f32 %v1125_v16, %v1125_v16  ;;  %566 = vmatpush.msrb.mxu1 %v551_v4  ;;  %v582_v13 = vld [vmem:[#allocation3 + $0x8] sm:$0xff]  ;;  %v583_v4 = vld [vmem:[#allocation3 + $0x10] sm:$0xff] }
  0xd4   :  { %v272_v39 = vmul.f32 0.7978846, %v256_v20  ;;  %v228_v40 = vmul.f32 %v212_v21, %v1118_v6  ;;  %620 = vmatmul.f32.gmra.mxu2 %v582_v13  ;;  %v296_v21 = vadd.f32 1.0, %v709_v51  ;;  %v311_v33 = vmul.f32 0.5, %v295_v5  ;;  %v1169_v5 = vpop.permute.xlu1 %411 }
  0xd5   :  { %712 = vtanh.f32 %v266_v25  ;;  %v219_v44 = vmul.f32 %v203_v27, %v1125_v16 }
  0xd6   :  { %714 = vtanh.f32 %v265_v19  ;;  %v244_v48 = vmul.f32 0.044715, %v228_v40  ;;  %v550_v19 = vld [vmem:[#allocation8 + $0x48] sm:$0xff]  ;;  %v312_v46 = vmul.f32 0.5, %v296_v21 }
  0xd7   :  { %v193_v45 = vpop.f32.mrf.mxu3  ;;  %716 = vtanh.f32 %v273_v35  ;;  %v235_v55 = vmul.f32 0.044715, %v219_v44  ;;  %567 = vmatpush.msrb.mxu1 %v550_v19  ;;  %v317_v35 = vmul.f32 0.5, %v301_v8  ;;  %v548_v44 = vld [vmem:[#allocation8 + $0x38] sm:$0xff] }
  0xd8   :  { %v1142_v49 = vadd.f32 %v1040_v52, %v193_v45  ;;  %718 = vtanh.f32 %v272_v39  ;;  %v260_v57 = vadd.f32 %v244_v48, %v1118_v6  ;;  %v166_v25 = vpop.f32.mrf.mxu0  ;;  %v318_v48 = vmul.f32 0.5, %v302_v23  ;;  %v545_v23 = vld [vmem:[#allocation8 + $0x20] sm:$0xff] }
  0xd9   :  { %720 = vtanh.f32 %v274_v43  ;;  %v251_v14 = vadd.f32 %v235_v55, %v1125_v16  ;;  %568 = vmatpush.msrb.mxu1 %v549_v30  ;;  %v1156_v41 = vadd.f32 %v1040_v52, %v166_v25  ;;  %v328_v19 = vmul.f32 %v312_v46, %v1049_v61  ;;  %v407_v21 = vpop.permute.xlu0 %406 }
  0xda   :  { %722 = vtanh.f32 %v271_v47  ;;  %v276_v2 = vmul.f32 0.7978846, %v260_v57  ;;  %v213_v3 = vmul.f32 %v1142_v49, %v1142_v49  ;;  %v327_v30 = vmul.f32 %v311_v33, %v1043_v56 }
  0xdb   :  { %v713_v60 = vpop.eup %712  ;;  %724 = vtanh.f32 %v275_v53  ;;  %v267_v39 = vmul.f32 0.7978846, %v251_v14  ;;  %569 = vmatpush.msrb.mxu1 %v548_v44  ;;  %v204_v55 = vmul.f32 %v1156_v41, %v1156_v41  ;;  %v546_v14 = vld [vmem:[#allocation8 + $0x28] sm:$0xff]  ;;  %v543_v44 = vld [vmem:[#allocation8 + $0x10] sm:$0xff]  ;;  %v440_v46 = vmul.f32 %v1132_v24, %v328_v19 }
  0xdc   :  { %v715_v0 = vpop.eup %714  ;;  %v298_v12 = vadd.f32 1.0, %v713_v60  ;;  %726 = vtanh.f32 %v276_v2  ;;  %v229_v28 = vmul.f32 %v213_v3, %v1142_v49  ;;  %623 = vmatmul.f32.gmra.mxu2 %v583_v4 }
  0xdd   :  { %v717_v20 = vpop.eup %716  ;;  %v297_v22 = vadd.f32 1.0, %v715_v0  ;;  %570 = vmatpush.msrb.mxu1 %v547_v58  ;;  %728 = vtanh.f32 %v267_v39 }
  0xde   :  { %v719_v27 = vpop.eup %718  ;;  %v314_v36 = vmul.f32 0.5, %v298_v12  ;;  %v245_v40 = vmul.f32 0.044715, %v229_v28  ;;  %v305_v2 = vadd.f32 1.0, %v717_v20  ;;  %v220_v12 = vmul.f32 %v204_v55, %v1156_v41  ;;  %v544_v28 = vld [vmem:[#allocation8 + $0x18] sm:$0xff] }
  0xdf   :  { %v196_v26 = vpop.f32.mrf.mxu3  ;;  %v721_v32 = vpop.eup %720  ;;  %v313_v47 = vmul.f32 0.5, %v297_v22  ;;  %v304_v50 = vadd.f32 1.0, %v719_v27  ;;  %571 = vmatpush.msrb.mxu1 %v546_v14 }
  0xe0   :  { %v723_v38 = vpop.eup %722  ;;  %v1159_v43 = vadd.f32 %v1040_v52, %v196_v26  ;;  %v306_v53 = vadd.f32 1.0, %v721_v32  ;;  %v261_v54 = vadd.f32 %v245_v40, %v1142_v49  ;;  %v1166_v52 = vpop.permute.xlu2 %401  ;;  %v330_v0 = vmul.f32 %v314_v36, %v1098_v37 }
  0xe1   :  { %v725_v45 = vpop.eup %724  ;;  %v303_v60 = vadd.f32 1.0, %v723_v38  ;;  %v329_v22 = vmul.f32 %v313_v47, %v1068_v10  ;;  %v320_v20 = vmul.f32 0.5, %v304_v50  ;;  %v236_v26 = vmul.f32 0.044715, %v220_v12  ;;  %572 = vmatpush.msrb.mxu1 %v545_v23  ;;  %v422_v4 = vpop.permute.xlu0 %421 }
  0xe2   :  { %v727_v51 = vpop.eup %726  ;;  %v214_v57 = vmul.f32 %v1159_v43, %v1159_v43  ;;  %v277_v8 = vmul.f32 0.7978846, %v261_v54  ;;  %v307_v37 = vadd.f32 1.0, %v725_v45  ;;  %v322_v25 = vmul.f32 0.5, %v306_v53  ;;  %v542_v53 = vld [vmem:[#allocation8 + $0x8] sm:$0xff] }
  0xe3   :  { %v308_v3 = vadd.f32 1.0, %v727_v51  ;;  %v334_v32 = vmul.f32 %v318_v48, %v1052_v63  ;;  %v319_v36 = vmul.f32 0.5, %v303_v60  ;;  %v442_v61 = vmul.f32 %v1127_v17, %v330_v0  ;;  %573 = vmatpush.msrb.mxu1 %v544_v28  ;;  %v584_v63 = vld [vmem:[#allocation3 + $0x18] sm:$0xff]  ;;  %v729_v33 = vpop.eup %728 }
  0xe4   :  { %v230_v13 = vmul.f32 %v214_v57, %v1159_v43  ;;  %730 = vtanh.f32 %v277_v8  ;;  %v321_v39 = vmul.f32 0.5, %v305_v2  ;;  %v252_v10 = vadd.f32 %v236_v26, %v1156_v41  ;;  %626 = vmatmul.f32.gmra.mxu2 %v584_v63  ;;  %v427_v2 = vpop.permute.xlu1 %426 }
  0xe5   :  { %v324_v38 = vmul.f32 0.5, %v308_v3  ;;  %v333_v45 = vmul.f32 %v317_v35, %v1046_v59  ;;  %v323_v47 = vmul.f32 0.5, %v307_v37  ;;  %v336_v56 = vmul.f32 %v320_v20, %v1104_v42  ;;  %574 = vmatpush.msrb.mxu1 %v543_v44 }
  0xe6   :  { %v246_v27 = vmul.f32 0.044715, %v230_v13  ;;  %v441_v48 = vmul.f32 %v1086_v29, %v329_v22  ;;  %v338_v17 = vmul.f32 %v322_v25, %v1073_v15  ;;  %v268_v50 = vmul.f32 0.7978846, %v252_v10  ;;  %v541_v29 = vld [vmem:[#allocation8] sm:$0xff] }
  0xe7   :  { %v439_v54 = vmul.f32 %v1093_v34, %v327_v30  ;;  %v335_v55 = vmul.f32 %v319_v36, %v1078_v18  ;;  %v340_v59 = vmul.f32 %v324_v38, %v1118_v6  ;;  %v446_v42 = vmul.f32 %v1147_v1, %v334_v32  ;;  %575 = vmatpush.msrb.mxu1 %v542_v53 }
  0xe8   :  { %v262_v40 = vadd.f32 %v246_v27, %v1159_v43  ;;  %v463_v35 = vadd.f32 %v442_v61, %v441_v48  ;;  %v337_v57 = vmul.f32 %v321_v39, %v1065_v9  ;;  %732 = vtanh.f32 %v268_v50  ;;  %v417_v60 = vpop.permute.xlu2 %416 }
  0xe9   :  { %v339_v15 = vmul.f32 %v323_v47, %v1091_v31  ;;  %v448_v58 = vmul.f32 %v407_v21, %v336_v56  ;;  %v299_v0 = vadd.f32 1.0, %v729_v33  ;;  %v445_v18 = vmul.f32 %v1151_v7, %v333_v45  ;;  %576 = vmatpush.msrb.mxu1 %v541_v29  ;;  %v437_v47 = vpop.permute.xlu0 %436 }
  0xea   :  { %v278_v51 = vmul.f32 0.7978846, %v262_v40  ;;  %v731_v24 = vpop.eup %730  ;;  %v456_v34 = vadd.f32 %v440_v46, %v439_v54  ;;  %v450_v6 = vmul.f32 %v417_v60, %v338_v17  ;;  %v447_v1 = vmul.f32 %v1166_v52, %v335_v55 }
  0xeb   :  { %v309_v3 = vadd.f32 1.0, %v731_v24  ;;  %v452_v9 = vmul.f32 %v427_v2, %v340_v59  ;;  %v477_v8 = vadd.f32 %v446_v42, %v445_v18  ;;  %v464_v12 = vrot.slane %v463_v35, 4 }
  0xec   :  { %734 = vtanh.f32 %v278_v51  ;;  %v449_v31 = vmul.f32 %v1169_v5, %v337_v57  ;;  %v451_v13 = vmul.f32 %v422_v4, %v339_v15  ;;  %v484_v14 = vadd.f32 %v448_v58, %v447_v1 }
  0xed   :  { %v315_v19 = vmul.f32 0.5, %v299_v0  ;;  %v457_v22 = vrot.slane %v456_v34, 4  ;;  %v325_v7 = vmul.f32 0.5, %v309_v3  ;;  %v478_v26 = vrot.slane %v477_v8, 4 }
  0xee   :  { %v733_v21 = vpop.eup %732  ;;  %v491_v37 = vadd.f32 %v450_v6, %v449_v31  ;;  %v498_v23 = vadd.f32 %v452_v9, %v451_v13  ;;  %v465_v27 = vadd.f32 %v464_v12, %v463_v35  ;;  %v485_v28 = vrot.slane %v484_v14, 4 }
  0xef   :  { %v300_v25 = vadd.f32 1.0, %v733_v21  ;;  %v331_v30 = vmul.f32 %v315_v19, %v1125_v16  ;;  %v458_v36 = vadd.f32 %v457_v22, %v456_v34  ;;  %v341_v5 = vmul.f32 %v325_v7, %v1142_v49 }
  0xf0   :  { %v492_v38 = vrot.slane %v491_v37, 4  ;;  %v499_v39 = vrot.slane %v498_v23, 4  ;;  %v479_v40 = vadd.f32 %v478_v26, %v477_v8  ;;  %v466_v44 = vrot.slane %v465_v27, 2  ;;  %v432_v63 = vpop.permute.xlu2 %431 }
  0xf1   :  { %v316_v32 = vmul.f32 0.5, %v300_v25  ;;  %v486_v46 = vadd.f32 %v485_v28, %v484_v14  ;;  %v443_v56 = vmul.f32 %v1120_v11, %v331_v30  ;;  %v459_v33 = vrot.slane %v458_v36, 2 }
  0xf2   :  { %v735_v20 = vpop.eup %734  ;;  %v493_v48 = vadd.f32 %v492_v38, %v491_v37  ;;  %v453_v17 = vmul.f32 %v432_v63, %v341_v5  ;;  %v500_v49 = vadd.f32 %v499_v39, %v498_v23  ;;  %v480_v53 = vrot.slane %v479_v40, 2  ;;  %v703_v38 = vld [vmem:[%s1216_s7] ss:$0 sm:$0xff] }
  0xf3   :  { %v310_v52 = vadd.f32 1.0, %v735_v20  ;;  %v332_v10 = vmul.f32 %v316_v32, %v1156_v41  ;;  %v467_v54 = vadd.f32 %v466_v44, %v465_v27  ;;  %v487_v55 = vrot.slane %v486_v46, 2 }
  0xf4   :  { %v460_v24 = vadd.f32 %v459_v33, %v458_v36  ;;  %v501_v35 = vrot.slane %v500_v49, 2  ;;  %v481_v11 = vadd.f32 %v480_v53, %v479_v40 }
  0xf5   :  { %v326_v61 = vmul.f32 0.5, %v310_v52  ;;  %v444_v16 = vmul.f32 %v1145_v62, %v332_v10  ;;  %v468_v29 = vrot.slane %v467_v54, 1  ;;  %v488_v58 = vadd.f32 %v487_v55, %v486_v46 }
  0xf6   :  { %v461_v60 = vrot.slane %v460_v24, 1  ;;  %v502_v34 = vadd.f32 %v501_v35, %v500_v49  ;;  %v482_v2 = vrot.slane %v481_v11, 1 }
  0xf7   :  { %v342_v45 = vmul.f32 %v326_v61, %v1159_v43  ;;  %v470_v51 = vadd.f32 %v444_v16, %v443_v56  ;;  %v494_v43 = vrot.slane %v493_v48, 2  ;;  %v469_v3 = vadd.f32 %v468_v29, %v467_v54 }
  0xf8   :  { %v489_v9 = vrot.slane %v488_v58, 1  ;;  %v462_v8 = vadd.f32 %v461_v60, %v460_v24  ;;  %v503_v13 = vrot.slane %v502_v34, 1  ;;  %v483_v19 = vadd.f32 %v482_v2, %v481_v11 }
  0xf9   :  { %v454_v50 = vmul.f32 %v437_v47, %v342_v45  ;;  %v471_v59 = vrot.slane %v470_v51, 4  ;;  %v495_v0 = vadd.f32 %v494_v43, %v493_v48 }
  0xfa   :  { %v521_v21 = vsel %vm520_vm0, %v469_v3, %v462_v8  ;;  %v490_v22 = vadd.f32 %v489_v9, %v488_v58  ;;  %v504_v25 = vadd.f32 %v503_v13, %v502_v34 }
  0xfb   :  { %v505_v41 = vadd.f32 %v454_v50, %v453_v17  ;;  %v472_v57 = vadd.f32 %v471_v59, %v470_v51  ;;  %v496_v12 = vrot.slane %v495_v0, 1 }
  0xfd   :  { %v506_v42 = vrot.slane %v505_v41, 4  ;;  %v473_v62 = vrot.slane %v472_v57, 2  ;;  %v497_v7 = vadd.f32 %v496_v12, %v495_v0 }
  0xff   :  { %v507_v15 = vadd.f32 %v506_v42, %v505_v41  ;;  %v474_v6 = vadd.f32 %v473_v62, %v472_v57 }
 0x101   :  { %v508_v18 = vrot.slane %v507_v15, 2  ;;  %v475_v4 = vrot.slane %v474_v6, 1 }
 0x103   :  { %v509_v1 = vadd.f32 %v508_v18, %v507_v15  ;;  %v476_v14 = vadd.f32 %v475_v4, %v474_v6 }
 0x105   :  { %v510_v31 = vrot.slane %v509_v1, 1  ;;  %v523_v37 = vsel %vm522_vm1, %v476_v14, %v521_v21 }
 0x106   :  { %v525_v23 = vsel %vm524_vm2, %v483_v19, %v523_v37 }
 0x107   :  { %v511_v20 = vadd.f32 %v510_v31, %v509_v1  ;;  %v527_v26 = vsel %vm526_vm3, %v490_v22, %v525_v23 }
 0x108   :  { %v529_v27 = vsel %vm528_vm4, %v497_v7, %v527_v26 }
 0x109   :  { %v531_v52 = vsel %vm530_vm5, %v504_v25, %v529_v27 }
 0x10a   :  { %v533_v28 = vsel %vm532_vm6, %v511_v20, %v531_v52 }
 0x10b   :  { %577 = vmatmul.f32.vlgmr.msrb.gmra.mxu1 %v533_v28 }
 0x14e   :  { %v618_v30 = vpop.f32.mrf.mxu2 }
 0x157   :  { %v621_v32 = vpop.f32.mrf.mxu2 }
 0x15f   :  { %v624_v36 = vpop.f32.mrf.mxu2 }
 0x167   :  { %v627_v39 = vpop.f32.mrf.mxu2 }
 0x188   :  { %v578_v5 = vpop.f32.mrf.mxu1 }
 0x189   :  { %v579_v61 = vadd.f32 %v703_v38, %v578_v5 }
 0x18b   :  { %v630_v10 = vadd.f32 %v618_v30, %v579_v61  ;;  %v631_v40 = vadd.f32 %v621_v32, %v579_v61  ;;  %v632_v44 = vadd.f32 %v624_v36, %v579_v61  ;;  %v633_v45 = vadd.f32 %v627_v39, %v579_v61 }
 0x18d   :  { %634 = vst [vmem:[#allocation11] sm:$0xff] %v630_v10 }
 0x18e   :  { %635 = vst [vmem:[#allocation11 + $0x8] sm:$0xff] %v631_v40 }
 0x18f   :  { %636 = vst [vmem:[#allocation11 + $0x10] sm:$0xff] %v632_v44 }
 0x190   :  { %637 = vst [vmem:[#allocation11 + $0x18] sm:$0xff] %v633_v45 }
 0x191   :  { %650 = dma.vmem_to_hbm [thread:$0]  %s643_s19, 512, %s645_s22, [#allocation5], %s865_s13, %s865_s13, %s866_s14  }
 0x192   :  { %862 = dma.done.wait [#allocation5], 512  }
 0x193   :  { %863 = vsyncadd [#allocation5], 4294966784 }
 0x194   :  { %655 = vsyncpa [#allocation4], 1 }
 0x195   :  { %656 = vsyncpa [#allocation7], 1 }
 0x196   :  { %657 = vsyncpa [#allocation10], 1 }
 0x197   :  { %658 = vsyncpa [#allocation5], 1 }

</bundles_post_ra>
